<compile_context>
chip_gen: v5e
topology: v5e:2x2
jax: 0.10.0
libtpu: 0.0.40
codegen_flags: <defaults>
</compile_context>

<pallas_src>
import functools
import math

import jax
import jax.numpy as jnp
from jax.experimental import pallas as pl
from jax.experimental.pallas import tpu as pltpu


def _round_up(x, m):
    return ((x + m - 1) // m) * m


def _cancelout_kernel(x_ref, w_ref, o_ref):
    # w_ref: (1, L) float32 weight row (same block every step -> DMA'd once).
    gate = jax.nn.sigmoid(w_ref[...])                  # f32, matches torch
    x = x_ref[...].astype(jnp.float32)                 # f32 multiply for parity
    o_ref[...] = (x * gate).astype(o_ref.dtype)        # single final rounding


@functools.partial(jax.jit, static_argnames=("target_block_bytes",))
def cancelout(x, weights, *, target_block_bytes=8 * 1024 * 1024):
    """CancelOut forward. x: (N, F), weights: (F,) -> (N, F) in x.dtype."""
    N, F = x.shape
    dtype = x.dtype
    itemsize = jnp.dtype(dtype).itemsize

    # ---- lane-dense slab layout: last dim L is a multiple of 128 ----------
    g = math.gcd(F, 128)
    rep = 128 // g          # x-rows packed per slab row
    L = F * rep             # = lcm(F, 128)

    # Sublane packing multiple for the row (second-minor) dimension.
    sub = {4: 8, 2: 16, 1: 32}.get(itemsize, 8)

    # ---- generation-aware VMEM budget (v7x has only 64 MiB per TC) --------
    try:
        vmem_cap = int(pltpu.get_tpu_info().vmem_capacity_bytes)
    except Exception:
        vmem_cap = 64 << 20  # conservative fallback (v7x per-TC size)
    cap = min(int(0.75 * vmem_cap), 100 << 20)
    # Resident ~= 2*(in block) + 2*(out block) + f32 temporaries (~2 blocks).
    eff_block_bytes = max(256 * 1024, min(target_block_bytes, cap // 6))

    # ---- pick layout: zero-copy (rep == 1) vs slab reshape -----------------
    if rep == 1:
        # F is already a multiple of 128: feed x directly, no pad, no slice.
        x_slab = x
        rows = N
        N_pad = N
    else:
        # Pad only to a multiple of rep (< rep padded rows); ragged last row
        # blocks handle sublane alignment, so no rep*sub padding is needed.
        N_pad = _round_up(max(N, 1), rep)
        if N_pad != N:
            x = jnp.pad(x, ((0, N_pad - N), (0, 0)))
        rows = N_pad // rep
        x_slab = x.reshape(rows, L)                    # row-major: free relayout

    w_row = jnp.tile(weights.astype(jnp.float32), rep).reshape(1, L)

    # ---- row tiling: ~eff_block_bytes blocks, streamed over the grid ------
    tile_rows = max(sub, (eff_block_bytes // (L * itemsize)) // sub * sub)
    if tile_rows >= rows:
        if rows >= 2 * sub:
            # Give the row axis >= 2 grid steps so v7x's two TensorCores both
            # get work (dimension_semantics=("parallel",) shards this axis).
            tile_rows = _round_up((rows + 1) // 2, sub)
        else:
            tile_rows = rows                           # full-extent block: OK
    grid = (pl.cdiv(rows, tile_rows),)

    out = pl.pallas_call(
        _cancelout_kernel,
        out_shape=jax.ShapeDtypeStruct((rows, L), dtype),
        grid_spec=pltpu.PrefetchScalarGridSpec(
            num_scalar_prefetch=0,
            grid=grid,
            in_specs=[
                pl.BlockSpec((tile_rows, L), lambda i: (i, 0)),
                pl.BlockSpec((1, L), lambda i: (0, 0)),
            ],
            out_specs=pl.BlockSpec((tile_rows, L), lambda i: (i, 0)),
        ),
        compiler_params=pltpu.CompilerParams(
            dimension_semantics=("parallel",),   # megacore-shard rows on v7x
            vmem_limit_bytes=int(cap),
        ),
    )(x_slab, w_row)

    if rep == 1:
        return out
    y = out.reshape(N_pad, F)
    return y if N_pad == N else y[:N]


if __name__ == "__main__":
    key = jax.random.PRNGKey(0)

    # --- small shapes consistent with the module's forward(): (N, inp) -----
    N, INP = 8, 32
    x = jax.random.normal(key, (N, INP), dtype=jnp.float32)
    # Deterministic param init matching the module: zeros(inp) + 4
    weights = jnp.zeros((INP,), dtype=jnp.float32) + 4.0

    y = jax.block_until_ready(cancelout(x, weights))
    y_ref = x * jax.nn.sigmoid(weights.astype(jnp.float32))[None, :]
    assert y.shape == x.shape and y.dtype == x.dtype
    assert jnp.allclose(y, y_ref, atol=1e-6, rtol=1e-6), "f32 mismatch"

    # bf16 path (slab layout, rep > 1): multiply is in f32, cast once at end.
    xb = x.astype(jnp.bfloat16)
    yb = jax.block_until_ready(cancelout(xb, weights))
    yb_ref = (xb.astype(jnp.float32)
              * jax.nn.sigmoid(weights)[None, :]).astype(jnp.bfloat16)
    assert jnp.allclose(yb.astype(jnp.float32), yb_ref.astype(jnp.float32),
                        atol=1e-3, rtol=1e-3), "bf16 mismatch"

    # rep == 1 zero-copy path with a ragged last row block (F % 128 == 0).
    key2 = jax.random.PRNGKey(1)
    x2 = jax.random.normal(key2, (40, 256), dtype=jnp.float32)
    w2 = jnp.zeros((256,), dtype=jnp.float32) + 4.0
    y2 = jax.block_until_ready(cancelout(x2, w2))
    y2_ref = x2 * jax.nn.sigmoid(w2)[None, :]
    assert jnp.allclose(y2, y2_ref, atol=1e-6, rtol=1e-6), "rep==1 mismatch"

    print("KERNEL_OK")
</pallas_src>

<mosaic_0001>
module attributes {stable_mosaic.version = 11 : i64} {
  func.func @_cancelout_kernel(%arg0: i32, %arg1: memref<2x128xf32, #tpu.memory_space<vmem>>, %arg2: memref<1x128xf32, #tpu.memory_space<vmem>>, %arg3: memref<2x128xf32, #tpu.memory_space<vmem>>) attributes {dimension_semantics = [#tpu.dimension_semantics<parallel>], iteration_bounds = array<i64: 1>, scalar_prefetch = 0 : i64, scratch_operands = 0 : i64, tpu.core_type = #tpu.core_type<tc>, window_params = [{transform_indices = @transform_0, window_bounds = array<i64: 2, 128>}, {pipeline_mode = #tpu.pipeline_mode<synchronous>, transform_indices = @transform_1, window_bounds = array<i64: 1, 128>}, {transform_indices = @transform_2, window_bounds = array<i64: 2, 128>}]} {
    %c0 = arith.constant 0 : index
    %c0_0 = arith.constant 0 : index
    %0 = vector.load %arg2[%c0, %c0_0] : memref<1x128xf32, #tpu.memory_space<vmem>>, vector<1x128xf32>
    %1 = arith.negf %0 : vector<1x128xf32>
    %2 = math.exp %1 : vector<1x128xf32>
    %cst = arith.constant 1.000000e+00 : f32
    %3 = vector.broadcast %cst : f32 to vector<1x128xf32>
    %4 = arith.addf %3, %2 : vector<1x128xf32>
    %5 = arith.divf %3, %4 : vector<1x128xf32>
    %c0_1 = arith.constant 0 : index
    %c0_2 = arith.constant 0 : index
    %6 = vector.load %arg1[%c0_1, %c0_2] : memref<2x128xf32, #tpu.memory_space<vmem>>, vector<2x128xf32>
    %7 = vector.broadcast %5 : vector<1x128xf32> to vector<2x128xf32>
    %8 = arith.mulf %6, %7 : vector<2x128xf32>
    %c0_3 = arith.constant 0 : index
    %c0_4 = arith.constant 0 : index
    %9 = vector.load %arg3[%c0_3, %c0_4] : memref<2x128xf32, #tpu.memory_space<vmem>>, vector<2x128xf32>
    tpu.vector_store %arg3[%c0_3, %c0_4], %8 {strides = array<i32>} : memref<2x128xf32, #tpu.memory_space<vmem>>, vector<2x128xf32>,
    return
  }
  func.func @transform_0(%arg0: i32) -> (i32, i32) {
    %c0_i32 = arith.constant 0 : i32
    %c0_i32_0 = arith.constant 0 : i32
    return %arg0, %c0_i32 : i32, i32
  }
  func.func @transform_1(%arg0: i32) -> (i32, i32) {
    %c0_i32 = arith.constant 0 : i32
    %c0_i32_0 = arith.constant 0 : i32
    %c0_i32_1 = arith.constant 0 : i32
    return %c0_i32, %c0_i32_0 : i32, i32
  }
  func.func @transform_2(%arg0: i32) -> (i32, i32) {
    %c0_i32 = arith.constant 0 : i32
    %c0_i32_0 = arith.constant 0 : i32
    return %arg0, %c0_i32 : i32, i32
  }
}

</mosaic_0001>

<bundles_post_ra>
// kernel: tile.9
= control target key start
LH: loop header
LB: loop body
LE: loop exit
PB: predicated region body
PF: predicated region fallthrough
CT: control target
= control target key end

     0   :  { %s37_s8 = smov 32   ;;  %s38_s9 = smov 64   ;;  %vm7_vm0 = vcmask 261120   ;;  %vm13_vm1 = vcmask 1048320   ;;  %vm19_vm2 = vcmask 785920   ;;  %vm25_vm3 = vcmask 523520   ;;  %s55_s0 = inlined_call_operand.vmem [shape: f32[4,32], index: 0, kind: input, shape index: {}]   ;;  %s56_s1 = inlined_call_operand.vmem [shape: f32[1,128], index: 1, kind: output, shape index: {}]  }
   0x1   :  { %v4_v0 = vld [vmem:[%s55_s0] sm:$0xf]  ;;  %s36_s0 = smov 96  }
   0x2   :  { %5 = vst [vmem:[#allocation1] sm:$0xf] %v4_v0 }
   0x9   :  { %v10_v1 = vld [vmem:[#allocation1 + $0x3] sm:$0x1]   ;;  %v22_v2 = vld [vmem:[#allocation1 + $0x1] sm:$0x1]   ;;  %v16_v3 = vld [vmem:[#allocation1 + $0x2] sm:$0x1]  }
   0xa   :  { %11 = vrot.lane.b32.xlu0 %v10_v1, %s36_s0  ;;  %23 = vrot.lane.b32.xlu1 %v22_v2, %s37_s8  ;;  %v6_v4 = vld [vmem:[#allocation1] sm:$0x1]  }
   0xb   :  { %8 = vst.msk [vmem:[#allocation0] sm:$0x1] %vm7_vm0, %v6_v4  }
  0x12   :  { %17 = vrot.lane.b32.xlu0 %v16_v3, %s38_s9 }
  0x7c   :  { %v12_v5 = vpop.permute.xlu0 %11   ;;  %v24_v6 = vpop.permute.xlu1 %23  }
  0x7d   :  { %14 = vst.msk [vmem:[#allocation0] sm:$0x1] %vm13_vm1, %v12_v5  }
  0x84   :  { %v18_v7 = vpop.permute.xlu0 %17  }
  0x85   :  { %20 = vst.msk [vmem:[#allocation0] sm:$0x1] %vm19_vm2, %v18_v7  }
  0x86   :  { %26 = vst.msk [vmem:[#allocation0] sm:$0x1] %vm25_vm3, %v24_v6  }
  0x8d   :  { %v29_v8 = vld [vmem:[#allocation0] sm:$0x1] }
  0x8e   :  { %32 = vst [vmem:[%s56_s1] sm:$0x1] %v29_v8 }

// kernel: tile.8
= control target key start
LH: loop header
LB: loop body
LE: loop exit
PB: predicated region body
PF: predicated region fallthrough
CT: control target
= control target key end

     0   :  { %s22_s0 = inlined_call_operand.vmem [shape: f32[32], index: 0, kind: input, shape index: {}]   ;;  %s23_s1 = inlined_call_operand.vmem [shape: f32[4,32], index: 1, kind: output, shape index: {}]  }
   0x1   :  { %v4_v0 = vld [vmem:[%s22_s0] ss:$0 sm:$0xff] }
   0x2   :  { %5 = vst [vmem:[%s23_s1] sm:$0xf] %v4_v0 }

// kernel: cancelout.1
= control target key start
LH: loop header
LB: loop body
LE: loop exit
PB: predicated region body
PF: predicated region fallthrough
CT: control target
= control target key end

     0   :  { %s70_s1 = inlined_call_operand.vmem [shape: f32[1,128], index: 1, kind: input, shape index: {}]   ;;  %s71_s0 = inlined_call_operand.vmem [shape: f32[2,128], index: 0, kind: input, shape index: {}]   ;;  %s72_s2 = inlined_call_operand.vmem [shape: f32[2,128], index: 2, kind: output, shape index: {}]  }
   0x1   :  { %v11_v0 = vld [vmem:[%s70_s1] sm:$0x1] }
   0x2   :  { %v41_v1 = vmul.f32 -1.442695, %v11_v0  ;;  %v31_v14 = vld [vmem:[%s71_s0] sm:$0x3] }
   0x4   :  { %42 = vpow2.f32 %v41_v1 }
   0xa   :  { %v43_v2 = vpop.eup %42 }
   0xb   :  { %v15_v3 = vadd.f32 1.0, %v43_v2 }
   0xd   :  { %44 = vrcp.f32 %v15_v3  ;;  %v27_v6 = vand.u32 2147483648, %v15_v3  ;;  %vm21_vm0 = vweird.f32 %v15_v3  ;;  %v25_v8 = vand.u32 2147483647, %v15_v3 }
   0xf   :  { %v28_v10 = vor.u32 1.1754944e-38, %v27_v6  ;;  %vm26_vm3 = vcmp.eq.f32.partialorder %v25_v8, 8.507059e+37 }
  0x13   :  { %v45_v4 = vpop.eup %44 }
  0x14   :  { %v17_v5 = vmul.f32 %v45_v4, %v15_v3  ;;  %vm22_vm1 = vweird.f32 %v45_v4 }
  0x15   :  { %vm23_vm2 = vmor %vm21_vm0, %vm22_vm1 }
  0x16   :  { %v18_v7 = vsub.f32 1.0, %v17_v5 }
  0x18   :  { %v19_v9 = vmul.f32 %v45_v4, %v18_v7 }
  0x1a   :  { %v20_v11 = vadd.f32 %v45_v4, %v19_v9 }
  0x1c   :  { %v24_v12 = vsel %vm23_vm2, %v45_v4, %v20_v11 }
  0x1d   :  { %v29_v13 = vsel %vm26_vm3, %v28_v10, %v24_v12 }
  0x1e   :  { %v33_v15 = vperm.slane %v29_v13, 0 }
  0x20   :  { %v35_v16 = vmul.f32 %v33_v15, %v31_v14 }
  0x22   :  { %36 = vst [vmem:[%s72_s2] sm:$0x3] %v35_v16 }

</bundles_post_ra>
